<compile_context>
chip_gen: v6e
topology: v6e:2x2x1
jax: 0.10.0
libtpu: 0.0.40
codegen_flags: <defaults>
</compile_context>

<pallas_src>
import functools

import jax
import jax.numpy as jnp
from jax.experimental import pallas as pl
from jax.experimental.pallas import tpu as pltpu

EPS = 1e-5     # InstanceNorm2d / BatchNorm2d default eps
LANE = 128     # keep the channel (minor) dim a multiple of the TPU lane width


def _round_up(x, m):
    return (x + m - 1) // m * m


# ----------------------------------------------------------------------------
# Pallas kernels
# ----------------------------------------------------------------------------
def _block_kernel(xs_ref, w1_ref, w2_ref, res_ref, rs_ref, rb_ref, o_ref,
                  y1p_ref, *, Ho, Wo, stride):
    """Fused ResNetBasicBlock forward for one batch sample.

    xs_ref : (1, s*s, Hs, Ws, Cx)  space-to-depth packed, spatially padded input
    w1_ref : (9, Cx, Cp)           conv1 weights, tap-major (t = dy*3 + dx)
    w2_ref : (9, Cp, Cp)           conv2 weights
    res_ref: (1, M, Cp)            residual (raw shortcut conv output, or identity)
    rs_ref : (1, Cp)               residual scale (folded BatchNorm; 1 for identity)
    rb_ref : (1, Cp)               residual shift (folded BatchNorm; 0 for identity)
    o_ref  : (1, M, Cp)            block output
    y1p_ref: (Ho+2, Wo+2, Cp)      VMEM scratch: conv1 activation with zero halo
    """
    s = stride
    M = Ho * Wo
    Cp = o_ref.shape[-1]
    Cx = xs_ref.shape[-1]
    inv_m = 1.0 / M

    # ---- conv1: 3x3, stride s, pad 1  (9 shifted matmuls on the MXU) ----
    acc = jnp.zeros((M, Cp), jnp.float32)
    for dy in range(3):
        for dx in range(3):
            t = dy * 3 + dx
            p = (dy % s) * s + (dx % s)          # parity plane of the s2d packing
            oy, ox = dy // s, dx // s            # offset inside that plane
            slab = xs_ref[0, p, oy:oy + Ho, ox:ox + Wo, :]       # (Ho, Wo, Cx)
            acc = acc + jnp.dot(slab.reshape(M, Cx), w1_ref[t],
                                preferred_element_type=jnp.float32)

    # ---- InstanceNorm (single-pass stats) + ReLU ----
    mean = jnp.sum(acc, axis=0, keepdims=True) * inv_m
    var = jnp.maximum(jnp.sum(acc * acc, axis=0, keepdims=True) * inv_m
                      - mean * mean, 0.0)
    y1 = jnp.maximum((acc - mean) * jax.lax.rsqrt(var + EPS), 0.0)

    # ---- stage conv1 activation with a zero halo for conv2's taps ----
    y1p_ref[...] = jnp.zeros_like(y1p_ref)
    y1p_ref[1:Ho + 1, 1:Wo + 1, :] = y1.reshape(Ho, Wo, Cp)

    # ---- conv2: 3x3, stride 1, pad 1 ----
    acc2 = jnp.zeros((M, Cp), jnp.float32)
    for dy in range(3):
        for dx in range(3):
            t = dy * 3 + dx
            slab = y1p_ref[dy:dy + Ho, dx:dx + Wo, :]            # (Ho, Wo, Cp)
            acc2 = acc2 + jnp.dot(slab.reshape(M, Cp), w2_ref[t],
                                  preferred_element_type=jnp.float32)

    # ---- InstanceNorm (single-pass stats) ----
    mean2 = jnp.sum(acc2, axis=0, keepdims=True) * inv_m
    var2 = jnp.maximum(jnp.sum(acc2 * acc2, axis=0, keepdims=True) * inv_m
                       - mean2 * mean2, 0.0)
    y2 = (acc2 - mean2) * jax.lax.rsqrt(var2 + EPS)

    # ---- residual add (shortcut BatchNorm pre-folded into scale/shift) + ReLU ----
    res = res_ref[0] * rs_ref[...] + rb_ref[...]
    o_ref[0] = jnp.maximum(y2 + res, 0.0)


def _shortcut_kernel(x_ref, w_ref, y_ref, s1_ref, s2_ref):
    """1x1 strided shortcut conv for one batch sample + running batch statistics.

    x_ref: (1, M, Cx)   stride-sampled input (1x1 conv == matmul)
    w_ref: (Cx, Cp)
    y_ref: (1, M, Cp)   raw conv output (BatchNorm applied later: stats are global)
    s1/s2: (1, Cp)      per-channel sum / sum-of-squares accumulated over the grid
    """
    n = pl.program_id(0)
    y = jnp.dot(x_ref[0], w_ref[...], preferred_element_type=jnp.float32)
    y_ref[0] = y

    @pl.when(n == 0)
    def _():
        s1_ref[...] = jnp.zeros_like(s1_ref)
        s2_ref[...] = jnp.zeros_like(s2_ref)

    s1_ref[...] += jnp.sum(y, axis=0, keepdims=True)
    s2_ref[...] += jnp.sum(y * y, axis=0, keepdims=True)


# ----------------------------------------------------------------------------
# pallas_call wrappers
# ----------------------------------------------------------------------------
def fused_block(xs, w1, w2, res, rscale, rshift, *, Ho, Wo, stride):
    N, S2, Hs, Ws, Cx = xs.shape
    Cp = w1.shape[-1]
    M = Ho * Wo

    # per-step VMEM: double-buffered blocks + scratch + headroom for value temps
    blk_bytes = 4 * (S2 * Hs * Ws * Cx + 9 * Cx * Cp + 9 * Cp * Cp + 2 * M * Cp + 2 * Cp)
    scratch_bytes = 4 * (Ho + 2) * (Wo + 2) * Cp
    temp_bytes = 4 * 6 * M * Cp
    vmem_limit = int(min(max(2 * blk_bytes + scratch_bytes + temp_bytes,
                             32 * 1024 * 1024), 56 * 1024 * 1024))
    # TODO(synk): for large feature maps (e.g. 56x56x512) additionally tile M with a
    # second grid axis and accumulate the InstanceNorm statistics across tiles.

    kern = functools.partial(_block_kernel, Ho=Ho, Wo=Wo, stride=stride)
    return pl.pallas_call(
        kern,
        out_shape=jax.ShapeDtypeStruct((N, M, Cp), jnp.float32),
        grid=(N,),
        in_specs=[
            pl.BlockSpec((1, S2, Hs, Ws, Cx), lambda n: (n, 0, 0, 0, 0)),
            pl.BlockSpec((9, Cx, Cp), lambda n: (0, 0, 0)),   # resident across grid
            pl.BlockSpec((9, Cp, Cp), lambda n: (0, 0, 0)),   # resident across grid
            pl.BlockSpec((1, M, Cp), lambda n: (n, 0, 0)),
            pl.BlockSpec((1, Cp), lambda n: (0, 0)),
            pl.BlockSpec((1, Cp), lambda n: (0, 0)),
        ],
        out_specs=pl.BlockSpec((1, M, Cp), lambda n: (n, 0, 0)),
        scratch_shapes=[pltpu.VMEM((Ho + 2, Wo + 2, Cp), jnp.float32)],
        compiler_params=pltpu.CompilerParams(
            dimension_semantics=("parallel",),      # samples are independent
            vmem_limit_bytes=vmem_limit),
    )(xs, w1, w2, res, rscale, rshift)


def shortcut_conv(xsc, wsc):
    N, M, Cx = xsc.shape
    Cp = wsc.shape[-1]
    return pl.pallas_call(
        _shortcut_kernel,
        out_shape=(jax.ShapeDtypeStruct((N, M, Cp), jnp.float32),
                   jax.ShapeDtypeStruct((1, Cp), jnp.float32),
                   jax.ShapeDtypeStruct((1, Cp), jnp.float32)),
        grid=(N,),
        in_specs=[pl.BlockSpec((1, M, Cx), lambda n: (n, 0, 0)),
                  pl.BlockSpec((Cx, Cp), lambda n: (0, 0))],
        out_specs=(pl.BlockSpec((1, M, Cp), lambda n: (n, 0, 0)),
                   pl.BlockSpec((1, Cp), lambda n: (0, 0)),
                   pl.BlockSpec((1, Cp), lambda n: (0, 0))),
        compiler_params=pltpu.CompilerParams(
            dimension_semantics=("arbitrary",)),    # stats accumulate across the grid
    )(xsc, wsc)


# ----------------------------------------------------------------------------
# JAX glue (layout plumbing, weight prep, parameter setup)
# ----------------------------------------------------------------------------
def _space_to_depth(x, stride):
    """(N, H, W, C) with conv pad=1, k=3, given stride -> (N, s*s, Hs, Ws, C)
    such that tap (dy, dx) is the contiguous slice
    [:, (dy%s)*s + dx%s, dy//s : dy//s + Ho, dx//s : dx//s + Wo, :]."""
    N, H, W, C = x.shape
    s = stride
    Ho = (H + 2 - 3) // s + 1
    Wo = (W + 2 - 3) // s + 1
    Hp = _round_up(H + 2, s)
    Wp = _round_up(W + 2, s)
    xp = jnp.pad(x, ((0, 0), (1, Hp - H - 1), (1, Wp - W - 1), (0, 0)))
    Hs, Ws = Hp // s, Wp // s
    xs = xp.reshape(N, Hs, s, Ws, s, C).transpose(0, 2, 4, 1, 3, 5)
    return xs.reshape(N, s * s, Hs, Ws, C), Ho, Wo


def _prep_conv_w(w_hwio, cin_pad, cout_pad):
    kh, kw, ci, co = w_hwio.shape
    w = jnp.pad(w_hwio, ((0, 0), (0, 0), (0, cin_pad - ci), (0, cout_pad - co)))
    return w.reshape(kh * kw, cin_pad, cout_pad)


def _pad_last(a, target):
    pad = target - a.shape[-1]
    if pad == 0:
        return a
    return jnp.pad(a, [(0, 0)] * (a.ndim - 1) + [(0, pad)])


def resnet_basic_block(x, params, downsampling, c_pad):
    """x: (N, H, W, Cx) NHWC (channel-padded except when this block owns a
    projection shortcut). Returns (N, Ho, Wo, c_pad)."""
    N, H, W, Cx = x.shape
    s = downsampling

    xs, Ho, Wo = _space_to_depth(x, s)
    M = Ho * Wo

    w1 = _prep_conv_w(params["w1"], Cx, c_pad)       # (9, Cx, c_pad)
    w2 = _prep_conv_w(params["w2"], c_pad, c_pad)    # (9, c_pad, c_pad)

    if params["wsc"] is not None:
        # projection shortcut: 1x1 conv (stride s) + BatchNorm2d (batch statistics)
        xsc = x[:, ::s, ::s, :].reshape(N, M, Cx)
        wsc = _pad_last(params["wsc"], c_pad)
        res, s1, s2 = shortcut_conv(xsc, wsc)
        cnt = N * M
        mean = s1[0] / cnt
        var = jnp.maximum(s2[0] / cnt - mean * mean, 0.0)
        gamma = _pad_last(params["bn_gamma"], c_pad)
        beta = _pad_last(params["bn_beta"], c_pad)
        rscale = gamma * jax.lax.rsqrt(var + EPS)
        rshift = beta - mean * rscale
    else:
        # identity shortcut (Cin == Cout implies stride 1 for this module)
        assert s == 1 and Cx == c_pad
        res = x.reshape(N, M, c_pad)
        rscale = jnp.ones((c_pad,), jnp.float32)
        rshift = jnp.zeros((c_pad,), jnp.float32)

    out = fused_block(xs, w1, w2, res,
                      rscale.reshape(1, c_pad), rshift.reshape(1, c_pad),
                      Ho=Ho, Wo=Wo, stride=s)
    return out.reshape(N, Ho, Wo, c_pad)


def resnet_layer(x_nchw, layer_params):
    """External NCHW (PyTorch) <-> internal channel-padded NHWC."""
    out_channels = layer_params[0][0]["w1"].shape[-1]
    c_pad = _round_up(out_channels, LANE)

    x = jnp.transpose(x_nchw, (0, 2, 3, 1)).astype(jnp.float32)
    if layer_params[0][0]["wsc"] is None:
        # no projection on the first block: identity residual must already carry
        # the padded channel layout
        x = _pad_last(x, c_pad)

    for block_params, ds in layer_params:
        x = resnet_basic_block(x, block_params, ds, c_pad)

    return jnp.transpose(x[..., :out_channels], (0, 3, 1, 2))


def init_layer_params(key, in_channels, out_channels, n):
    """Deterministic synthetic weights; conv weights in HWIO (dy, dx, cin, cout)."""
    downsampling = 2 if in_channels != out_channels else 1
    blocks = []
    cin, ds = in_channels, downsampling
    for _ in range(n):
        key, k1, k2, k3 = jax.random.split(key, 4)
        p = {
            "w1": 0.1 * jax.random.normal(k1, (3, 3, cin, out_channels), jnp.float32),
            "w2": 0.1 * jax.random.normal(k2, (3, 3, out_channels, out_channels), jnp.float32),
            "wsc": None,
        }
        if cin != out_channels:  # should_apply_shortcut
            p["wsc"] = 0.1 * jax.random.normal(k3, (cin, out_channels), jnp.float32)
            p["bn_gamma"] = jnp.ones((out_channels,), jnp.float32)   # BatchNorm2d defaults
            p["bn_beta"] = jnp.zeros((out_channels,), jnp.float32)
        blocks.append((p, ds))
        cin, ds = out_channels, 1
    return blocks


if __name__ == "__main__":
    key = jax.random.PRNGKey(0)
    kx, kp = jax.random.split(key)

    N, Cin, H, W = 2, 4, 16, 16
    Cout, n_blocks = 8, 1

    x = jax.random.normal(kx, (N, Cin, H, W), jnp.float32)
    params = init_layer_params(kp, Cin, Cout, n_blocks)

    out = resnet_layer(x, params)
    out = jax.block_until_ready(out)
    assert out.shape == (N, Cout, H // 2, W // 2), out.shape
    assert bool(jnp.all(jnp.isfinite(out)))
    print("KERNEL_OK")
</pallas_src>

<mosaic_0001>
module attributes {stable_mosaic.version = 11 : i64} {
  func.func @_shortcut_kernel(%arg0: i32, %arg1: memref<1x64x4xf32, #tpu.memory_space<vmem>>, %arg2: memref<4x128xf32, #tpu.memory_space<vmem>>, %arg3: memref<1x64x128xf32, #tpu.memory_space<vmem>>, %arg4: memref<1x128xf32, #tpu.memory_space<vmem>>, %arg5: memref<1x128xf32, #tpu.memory_space<vmem>>) attributes {dimension_semantics = [#tpu.dimension_semantics<arbitrary>], iteration_bounds = array<i64: 2>, scalar_prefetch = 0 : i64, scratch_operands = 0 : i64, tpu.core_type = #tpu.core_type<tc>, window_params = [{transform_indices = @transform_0, window_bounds = array<i64: 1, 64, 4>}, {pipeline_mode = #tpu.pipeline_mode<synchronous>, transform_indices = @transform_1, window_bounds = array<i64: 4, 128>}, {transform_indices = @transform_2, window_bounds = array<i64: 1, 64, 128>}, {pipeline_mode = #tpu.pipeline_mode<synchronous>, transform_indices = @transform_3, window_bounds = array<i64: 1, 128>}, {pipeline_mode = #tpu.pipeline_mode<synchronous>, transform_indices = @transform_4, window_bounds = array<i64: 1, 128>}]} {
    %c0 = arith.constant 0 : index
    %c0_0 = arith.constant 0 : index
    %c0_1 = arith.constant 0 : index
    %0 = vector.load %arg1[%c0, %c0_0, %c0_1] : memref<1x64x4xf32, #tpu.memory_space<vmem>>, vector<1x64x4xf32>
    %1 = vector.shape_cast %0 : vector<1x64x4xf32> to vector<64x4xf32>
    %c0_2 = arith.constant 0 : index
    %c0_3 = arith.constant 0 : index
    %2 = vector.load %arg2[%c0_2, %c0_3] : memref<4x128xf32, #tpu.memory_space<vmem>>, vector<4x128xf32>
    %cst = arith.constant dense<0.000000e+00> : vector<64x128xf32>
    %3 = tpu.matmul %1, %2, %cst {dimension_numbers = #tpu.dot_dimension_numbers<[1], [0], [0], [1], [0, 0, 1, 1], [], []>} : vector<64x4xf32>, vector<4x128xf32>, vector<64x128xf32> -> vector<64x128xf32>
    %c0_4 = arith.constant 0 : index
    %c0_5 = arith.constant 0 : index
    %c0_6 = arith.constant 0 : index
    %4 = vector.load %arg3[%c0_4, %c0_5, %c0_6] : memref<1x64x128xf32, #tpu.memory_space<vmem>>, vector<1x64x128xf32>
    %5 = vector.shape_cast %4 : vector<1x64x128xf32> to vector<64x128xf32>
    %6 = vector.shape_cast %3 : vector<64x128xf32> to vector<1x64x128xf32>
    tpu.vector_store %arg3[%c0_4, %c0_5, %c0_6], %6 {strides = array<i32>} : memref<1x64x128xf32, #tpu.memory_space<vmem>>, vector<1x64x128xf32>,
    %c0_i32 = arith.constant 0 : i32
    %7 = arith.cmpi eq, %arg0, %c0_i32 : i32
    %8 = arith.extui %7 : i1 to i32
    %c0_i32_7 = arith.constant 0 : i32
    %9 = arith.cmpi ne, %8, %c0_i32_7 : i32
    scf.if %9 {
      %cst_18 = arith.constant 0.000000e+00 : f32
      %21 = vector.broadcast %cst_18 : f32 to vector<1x128xf32>
      %c0_19 = arith.constant 0 : index
      %c0_20 = arith.constant 0 : index
      %22 = vector.load %arg4[%c0_19, %c0_20] : memref<1x128xf32, #tpu.memory_space<vmem>>, vector<1x128xf32>
      tpu.vector_store %arg4[%c0_19, %c0_20], %21 {strides = array<i32>} : memref<1x128xf32, #tpu.memory_space<vmem>>, vector<1x128xf32>,
      %cst_21 = arith.constant 0.000000e+00 : f32
      %23 = vector.broadcast %cst_21 : f32 to vector<1x128xf32>
      %c0_22 = arith.constant 0 : index
      %c0_23 = arith.constant 0 : index
      %24 = vector.load %arg5[%c0_22, %c0_23] : memref<1x128xf32, #tpu.memory_space<vmem>>, vector<1x128xf32>
      tpu.vector_store %arg5[%c0_22, %c0_23], %23 {strides = array<i32>} : memref<1x128xf32, #tpu.memory_space<vmem>>, vector<1x128xf32>,
    } else {
    }
    %c0_8 = arith.constant 0 : index
    %c0_9 = arith.constant 0 : index
    %10 = vector.load %arg4[%c0_8, %c0_9] : memref<1x128xf32, #tpu.memory_space<vmem>>, vector<1x128xf32>
    %cst_10 = arith.constant dense<0.000000e+00> : vector<128xf32>
    %11 = vector.multi_reduction <add>, %3, %cst_10 [0] : vector<64x128xf32> to vector<128xf32>
    %12 = vector.shape_cast %11 : vector<128xf32> to vector<1x128xf32>
    %13 = arith.addf %10, %12 : vector<1x128xf32>
    %c0_11 = arith.constant 0 : index
    %c0_12 = arith.constant 0 : index
    %14 = vector.load %arg4[%c0_11, %c0_12] : memref<1x128xf32, #tpu.memory_space<vmem>>, vector<1x128xf32>
    tpu.vector_store %arg4[%c0_11, %c0_12], %13 {strides = array<i32>} : memref<1x128xf32, #tpu.memory_space<vmem>>, vector<1x128xf32>,
    %c0_13 = arith.constant 0 : index
    %c0_14 = arith.constant 0 : index
    %15 = vector.load %arg5[%c0_13, %c0_14] : memref<1x128xf32, #tpu.memory_space<vmem>>, vector<1x128xf32>
    %16 = arith.mulf %3, %3 : vector<64x128xf32>
    %cst_15 = arith.constant dense<0.000000e+00> : vector<128xf32>
    %17 = vector.multi_reduction <add>, %16, %cst_15 [0] : vector<64x128xf32> to vector<128xf32>
    %18 = vector.shape_cast %17 : vector<128xf32> to vector<1x128xf32>
    %19 = arith.addf %15, %18 : vector<1x128xf32>
    %c0_16 = arith.constant 0 : index
    %c0_17 = arith.constant 0 : index
    %20 = vector.load %arg5[%c0_16, %c0_17] : memref<1x128xf32, #tpu.memory_space<vmem>>, vector<1x128xf32>
    tpu.vector_store %arg5[%c0_16, %c0_17], %19 {strides = array<i32>} : memref<1x128xf32, #tpu.memory_space<vmem>>, vector<1x128xf32>,
    return
  }
  func.func @transform_0(%arg0: i32) -> (i32, i32, i32) {
    %c0_i32 = arith.constant 0 : i32
    %c0_i32_0 = arith.constant 0 : i32
    %c0_i32_1 = arith.constant 0 : i32
    return %arg0, %c0_i32, %c0_i32_0 : i32, i32, i32
  }
  func.func @transform_1(%arg0: i32) -> (i32, i32) {
    %c0_i32 = arith.constant 0 : i32
    %c0_i32_0 = arith.constant 0 : i32
    %c0_i32_1 = arith.constant 0 : i32
    return %c0_i32, %c0_i32_0 : i32, i32
  }
  func.func @transform_2(%arg0: i32) -> (i32, i32, i32) {
    %c0_i32 = arith.constant 0 : i32
    %c0_i32_0 = arith.constant 0 : i32
    %c0_i32_1 = arith.constant 0 : i32
    return %arg0, %c0_i32, %c0_i32_0 : i32, i32, i32
  }
  func.func @transform_3(%arg0: i32) -> (i32, i32) {
    %c0_i32 = arith.constant 0 : i32
    %c0_i32_0 = arith.constant 0 : i32
    %c0_i32_1 = arith.constant 0 : i32
    return %c0_i32, %c0_i32_0 : i32, i32
  }
  func.func @transform_4(%arg0: i32) -> (i32, i32) {
    %c0_i32 = arith.constant 0 : i32
    %c0_i32_0 = arith.constant 0 : i32
    %c0_i32_1 = arith.constant 0 : i32
    return %c0_i32, %c0_i32_0 : i32, i32
  }
}

</mosaic_0001>

<bundles_post_ra>
// kernel: tpu_custom_call.1
= control target key start
LH: loop header
LB: loop body
LE: loop exit
PB: predicated region body
PF: predicated region fallthrough
CT: control target
= control target key end

     0   :  { %10 = vsyncpa [#allocation3], 0  ;;  %s923_s0 = inlined_call_operand.vmem [shape: f32[2,64,4], index: 0, kind: input, shape index: {}]   ;;  %s924_s1 = inlined_call_operand.vmem [shape: f32[4,128], index: 1, kind: input, shape index: {}]   ;;  %s925_s2 = inlined_call_operand.hbm [shape: f32[2,64,128], index: 2, kind: output, shape index: {0}]   ;;  %s926_s3 = inlined_call_operand.hbm [shape: f32[1,128], index: 3, kind: output, shape index: {1}]   ;;  %s927_s4 = inlined_call_operand.hbm [shape: f32[1,128], index: 4, kind: output, shape index: {2}]  }
   0x1   :  { %12 = vsyncpa [#allocation3 + $0x1], 0 }
   0x2   :  { %13 = vsyncpa [#allocation5], 0  ;;  %s762_s15 = smov 0   ;;  %s764_s16 = smov 0  }
   0x3   :  { %s766_s17 = smov 0   ;;  %s768_s18 = smov 0  }
   0x4 LB: > { %s783_s19 = sadd.s32 4294967295, %s729_s18   ;;  %s508_s20 = sadd.s32 4294967294, %s729_s18   ;;  %s729_s18 = sphi %s768_s18, %s933_s18   ;;  %s725_s17 = sphi %s766_s17, %s932_s17   ;;  %s721_s16 = sphi %s764_s16, %s931_s16   ;;  %s717_s15 = sphi %s762_s15, %s930_s15  }
   0x5   : > { %s787_s21 = sadd.s32 1, %s729_s18   ;;  %s73_s22 = sadd.s32 1, %s725_s17 }
   0x6   : > { %s70_s23 = ssub.s32 %s729_s18, %s787_s21  ;;  %p83_p0 = scmp.ne.s32.totalorder %s725_s17, %s721_s16 }
   0x7   : > { %p71_p1 = scmp.eq.s32.totalorder %s70_s23, 0  ;;  %p84_p2 = scmp.eq.s32.totalorder %s783_s19, 1 }
   0x8   : > { %p89_p3 = scmp.ne.s32.totalorder %s721_s16, %s717_s15  ;;  %p90_p4 = scmp.eq.s32.totalorder %s508_s20, 1 }
   0x9   : > { %s798_s24 = scalar_select %p71_p1, %s725_s17, %s73_s22  }
   0xa   : > { %p802_p5 = por %p84_p2, %p83_p0  ;;  %p806_p6 = por %p90_p4, %p89_p3 }
   0xb   : > { %p511_p7 = scmp.ge.s32.totalorder %s729_s18, 1  ;;  %p161_p8 = scmp.lt.s32.totalorder %s729_s18, 3 }
   0xd   : > { %p162_p9 = pnand %p511_p7, %p161_p8 }
   0xe   : > { %p187_p10 = scmp.lt.s32.totalorder (!%p162_p9), %s783_s19, 1  ;;  %s180_s8 = sand.u32 (!%p162_p9), 1, %s721_s16  }
   0xf   : > { %165 = sbr.rel (%p162_p9) target bundleno = 287 (0x11f), region = 28  ;;  %s512_s9 = sshll.u32 (!%p162_p9), %s180_s8, 6 }
  0x10   : > { %s833_s10 = scalar_lea.vmem (!%p162_p9), [#allocation2], %s512_s9  ;;  %p524_p11 = scmp.ne.s32.totalorder (!%p162_p9), %s783_s19, 0 }
  0x14   : > { %v200_v0 = vld [vmem:[%s924_s1] sm:$0xf]  ;;  %vm226_vm0 = vcmask 1043456   ;;  %s188_s29 = scalar_select %p187_p10, %s783_s19, 1  ;;  %vm201_vm1 = vcmask 31744  }
  0x15   : > { %545 = vmatprep.subr.msk.mxu0 %vm226_vm0, %v200_v0  ;;  %559 = vmatprep.subr.msk.mxu1 %vm226_vm0, %v200_v0 }
  0x16   : > { %546 = vmatpush3.msk.msra.mxu0 %vm226_vm0, %v200_v0  ;;  %560 = vmatpush3.msk.msra.mxu1 %vm226_vm0, %v200_v0  ;;  %s534_s30 = sshll.u32 %s188_s29, 6 }
  0x17   : > { %s191_s7 = scalar_lea.vmem %s923_s0, %s534_s30 }
  0x18   : > { %v192_v1 = vld [vmem:[%s191_s7] sm:$0xff]  ;;  %v193_v3 = vld [vmem:[%s191_s7 + $0x8] sm:$0xff]  ;;  %v194_v5 = vld [vmem:[%s191_s7 + $0x10] sm:$0xff] }
  0x19   : > { %v196_v2 = vld [vmem:[%s191_s7 + $0x20] sm:$0xff]  ;;  %547 = vmatprep.mubr.msk.f32.mxu0 %vm201_vm1, %v192_v1  ;;  %v197_v4 = vld [vmem:[%s191_s7 + $0x28] sm:$0xff]  ;;  %v198_v6 = vld [vmem:[%s191_s7 + $0x30] sm:$0xff] }
  0x1a   : > { %553 = vmatprep.mubr.msk.f32.mxu1 %vm201_vm1, %v196_v2  ;;  %548 = vmatmul.mubr.msk.f32.vlgmr.msra.gmra.mxu0 %vm201_vm1, %v193_v3  ;;  %v195_v7 = vld [vmem:[%s191_s7 + $0x18] sm:$0xff] }
  0x1b   : > { %554 = vmatmul.mubr.msk.f32.vlgmr.msra.gmra.mxu1 %vm201_vm1, %v197_v4  ;;  %550 = vmatprep.mubr.msk.f32.mxu0 %vm201_vm1, %v194_v5  ;;  %v199_v8 = vld [vmem:[%s191_s7 + $0x38] sm:$0xff] }
  0x1c   : > { %556 = vmatprep.mubr.msk.f32.mxu1 %vm201_vm1, %v198_v6 }
  0x1e   : > { %551 = vmatmul.mubr.msk.f32.gmra.mxu0 %vm201_vm1, %v195_v7 }
  0x1f   : > { %557 = vmatmul.mubr.msk.f32.gmra.mxu1 %vm201_vm1, %v199_v8 }
  0xda   : > { %v549_v9 = vpop.f32.mrf.mxu0 }
  0xdb   : > { %v831_v10 = vpop.f32.mrf.mxu1  ;;  %336 = vst [vmem:[%s833_s10 + $0x8] sm:$0xff] %v549_v9 }
  0xdc   : > { %340 = vst [vmem:[%s833_s10 + $0x28] sm:$0xff] %v831_v10  ;;  %v296_v11 = vpop.f32.mrf.mxu0 }
  0xdd   : > { %v316_v12 = vpop.f32.mrf.mxu1  ;;  %335 = vst [vmem:[%s833_s10] sm:$0xff] %v296_v11 }
  0xde   : > { %339 = vst [vmem:[%s833_s10 + $0x20] sm:$0xff] %v316_v12  ;;  %v552_v13 = vpop.f32.mrf.mxu0  ;;  %346 = sbr.rel (%p524_p11) target bundleno = 229 (0xe5), region = 32 }
  0xdf   : > { %v840_v14 = vpop.f32.mrf.mxu1  ;;  %338 = vst [vmem:[%s833_s10 + $0x18] sm:$0xff] %v552_v13 }
  0xe0   : > { %342 = vst [vmem:[%s833_s10 + $0x38] sm:$0xff] %v840_v14  ;;  %v306_v15 = vpop.f32.mrf.mxu0 }
  0xe1   : > { %v326_v16 = vpop.f32.mrf.mxu1  ;;  %337 = vst [vmem:[%s833_s10 + $0x10] sm:$0xff] %v306_v15 }
  0xe2   : > { %341 = vst [vmem:[%s833_s10 + $0x30] sm:$0xff] %v326_v16 }
  0xe3   : > { %v731_v17 = vmov 0.0  }
  0xe4   : > { %347 = vst [vmem:[#allocation4] sm:$0x1] %v731_v17  ;;  %348 = vst [vmem:[#allocation6] sm:$0x1] %v731_v17 }
  0xe5 PF: > { %v350_v18 = vadd.f32 %v549_v9, %v296_v11  ;;  %v366_v19 = vmul.f32 %v296_v11, %v296_v11  ;;  %v367_v20 = vmul.f32 %v549_v9, %v549_v9  ;;  %v368_v21 = vmul.f32 %v306_v15, %v306_v15  ;;  %s535_s11 = sshll.u32 %s783_s19, 10  ;;  %s403_s20 = sshll.u32 %s833_s10, 4  ;;  %s855_s20 = int_to_ptr.vmem [resolvable:$true] %s403_s20 }
  0xe6   : > { %v369_v23 = vmul.f32 %v552_v13, %v552_v13  ;;  %s852_s14 = scalar_lea.hbm %s925_s2, %s535_s11  ;;  %v370_v26 = vmul.f32 %v316_v12, %v316_v12  ;;  %v371_v29 = vmul.f32 %v831_v10, %v831_v10  ;;  %s861_s22 = scalar_lea.sflag [#allocation3], %s180_s8 }
  0xe7   : > { %v351_v22 = vadd.f32 %v350_v18, %v306_v15  ;;  %v374_v24 = vadd.f32 %v367_v20, %v366_v19  ;;  %s617_s23 = scalar_lea.vmem %s855_s20, 1024  ;;  %s732_s27 = smov [#allocation2]  }
  0xe8   : > { %p618_p12 = scmp.ne.s32.totalorder %s855_s20, %s617_s23  ;;  %s621_s28 = sshll.u32 %s732_s27, 4  ;;  %s622_s28 = int_to_ptr.vmem [resolvable:$false] %s621_s28 }
  0xe9   : > { %v352_v25 = vadd.f32 %v552_v13, %v351_v22  ;;  %v375_v27 = vadd.f32 %v374_v24, %v368_v21  ;;  %s623_s29 = scalar_lea.vmem %s622_s28, 2048  ;;  %p624_p1 = scmp.lt.s32.totalorder %s855_s20, %s622_s28 }
  0xea   : > { %p619_p13 = pnand %p618_p12, %p802_p5  ;;  %p625_p3 = scmp.lt.s32.totalorder %s623_s29, %s617_s23 }
  0xeb   : > { %v353_v28 = vadd.f32 %v352_v25, %v316_v12  ;;  %v376_v30 = vadd.f32 %v375_v27, %v369_v23 }
  0xec   : > { %p620_p0 = pneg %p619_p13  ;;  %p626_p4 = por %p625_p3, %p624_p1 }
  0xee   : > { %p627_p7 = pnand %p626_p4, %p620_p0 }
  0xf0   : > { %630 = shalt.err (!%p627_p7)
}
  0xf1   : > { %s631_s30 = scalar_lea.hbm %s852_s14, 1024  ;;  %s635_s7 = scalar_lea.hbm %s925_s2, 2048 }
  0xf2   : > { %p632_p8 = scmp.ne.s32.totalorder %s852_s14, %s631_s30  ;;  %p636_p11 = scmp.lt.s32.totalorder %s852_s14, %s925_s2 }
  0xf3   : > { %p637_p12 = scmp.lt.s32.totalorder %s635_s7, %s631_s30 }
  0xf4   : > { %p633_p9 = pnand %p632_p8, %p802_p5 }
  0xf5   : > { %p638_p13 = por %p637_p12, %p636_p11 }
  0xf6   : > { %p634_p10 = pneg %p633_p9 }
  0xf8   : > { %p639_p0 = pnand %p638_p13, %p634_p10 }
  0xfa   : > { %642 = shalt.err (!%p639_p0)
}
  0xfb   : > { %s733_s10 = smov 128   ;;  %s734_s11 = smov 8   ;;  %v354_v31 = vadd.f32 %v831_v10, %v353_v28  ;;  %v372_v32 = vmul.f32 %v326_v16, %v326_v16  ;;  %v377_v33 = vadd.f32 %v376_v30, %v370_v26  ;;  %v373_v35 = vmul.f32 %v840_v14, %v840_v14  ;;  %v349_v49 = vld [vmem:[#allocation4] sm:$0x1]  ;;  %v365_v52 = vld [vmem:[#allocation6] sm:$0x1] }
  0xfc   : > { %561 = dma.vmem_to_hbm [thread:$0]  (%p802_p5), %s855_s20, 1024, %s852_s14, %s861_s22, %s733_s10, %s733_s10, %s734_s11  }
  0xfd   : > { %v355_v34 = vadd.f32 %v354_v31, %v326_v16  ;;  %v378_v36 = vadd.f32 %v377_v33, %v371_v29  ;;  %s735_s25 = smov [#allocation4]   ;;  %s736_s13 = smov [#allocation6]  }
  0xfe   : > { %s417_s12 = sshll.u32 %s735_s25, 4  ;;  %s428_s14 = sshll.u32 %s736_s13, 4  ;;  %s418_s12 = int_to_ptr.vmem [resolvable:$true] %s417_s12  ;;  %s429_s14 = int_to_ptr.vmem [resolvable:$true] %s428_s14 }
  0xff   : > { %v356_v37 = vadd.f32 %v840_v14, %v355_v34  ;;  %v379_v38 = vadd.f32 %v378_v36, %v372_v32  ;;  %s643_s20 = scalar_lea.vmem %s418_s12, 16  ;;  %s649_s22 = scalar_lea.vmem %s418_s12, 32 }
 0x100   : > { %p644_p5 = scmp.ne.s32.totalorder %s418_s12, %s643_s20  ;;  %p650_p4 = scmp.lt.s32.totalorder %s418_s12, %s418_s12 }
 0x101   : > { %v357_v39 = vrot.slane %v356_v37, 4  ;;  %v380_v40 = vadd.f32 %v379_v38, %v373_v35  ;;  %p651_p7 = scmp.lt.s32.totalorder %s649_s22, %s643_s20 }
 0x102   : > { %p645_p1 = pnand %p644_p5, %p84_p2 }
 0x103   : > { %v358_v41 = vadd.f32 %v357_v39, %v356_v37  ;;  %v381_v42 = vrot.slane %v380_v40, 4  ;;  %p652_p8 = por %p651_p7, %p650_p4 }
 0x104   : > { %p646_p3 = pneg %p645_p1 }
 0x105   : > { %v359_v43 = vrot.slane %v358_v41, 2  ;;  %v382_v44 = vadd.f32 %v381_v42, %v380_v40 }
 0x106   : > { %p653_p9 = pnand %p652_p8, %p646_p3 }
 0x107   : > { %v360_v45 = vadd.f32 %v359_v43, %v358_v41  ;;  %v383_v46 = vrot.slane %v382_v44, 2 }
 0x109   : > { %v361_v47 = vrot.slane %v360_v45, 1  ;;  %v384_v48 = vadd.f32 %v383_v46, %v382_v44 }
 0x10b   : > { %v362_v50 = vadd.f32 %v361_v47, %v360_v45  ;;  %v385_v51 = vrot.slane %v384_v48, 1 }
 0x10d   : > { %v363_v53 = vadd.f32 %v362_v50, %v349_v49  ;;  %v386_v54 = vadd.f32 %v385_v51, %v384_v48 }
 0x10f   : > { %364 = vst [vmem:[#allocation4] sm:$0x1] %v363_v53  ;;  %v387_v55 = vadd.f32 %v386_v54, %v365_v52 }
 0x110   : > { %656 = shalt.err (!%p653_p9)
}
 0x111   : > { %563 = dma.vmem_to_hbm [thread:$0]  (%p84_p2), %s418_s12, 16, %s926_s3, [#allocation5]   ;;  %388 = vst [vmem:[#allocation6] sm:$0x1] %v387_v55 }
 0x112   : > { %s667_s28 = scalar_lea.vmem %s429_s14, 16  ;;  %s673_s29 = scalar_lea.vmem %s429_s14, 32 }
 0x113   : > { %p668_p10 = scmp.ne.s32.totalorder %s429_s14, %s667_s28  ;;  %p674_p13 = scmp.lt.s32.totalorder %s429_s14, %s429_s14 }
 0x114   : > { %p675_p0 = scmp.lt.s32.totalorder %s673_s29, %s667_s28 }
 0x115   : > { %p669_p11 = pnand %p668_p10, %p84_p2 }
 0x116   : > { %p676_p5 = por %p675_p0, %p674_p13 }
 0x117   : > { %p670_p12 = pneg %p669_p11 }
 0x119   : > { %p677_p1 = pnand %p676_p5, %p670_p12 }
 0x11b   : > { %680 = shalt.err (!%p677_p1)
}
 0x11c   : > { %565 = dma.vmem_to_hbm [thread:$0]  (%p84_p2), %s429_s14, 16, %s927_s4, [#allocation5]  }
 0x11d   : > { %708 = dma.done.wait (%p84_p2), [#allocation5], 32  }
 0x11e   : > { %710 = vsyncadd (%p84_p2), [#allocation5], 4294967264 }
 0x11f PF: > { %p579_p3 = scmp.ge.s32.totalorder %s729_s18, 2  ;;  %s448_s6 = sand.u32 1, %s717_s15  }
 0x120   : > { %s449_s7 = scalar_lea.sflag [#allocation3], %s448_s6 }
 0x121   : > { %p572_p4 = pnand %p579_p3, %p806_p6 }
 0x123   : > { %p573_p7 = pneg %p572_p4 }
 0x125   : > { %712 = dma.done.wait (%p573_p7), %s449_s7, 1024  }
 0x126   : > { %714 = vsyncadd (%p573_p7), %s449_s7, 4294966272  ;;  %p16_p8 = scmp.ge.s32.totalorder %s787_s21, 4   ;;  %s930_s15 = smov %s721_s16 }
 0x127   : > { %s931_s16 = smov %s725_s17  ;;  %s932_s17 = smov %s798_s24 }
 0x128   : > { %s933_s18 = smov %s787_s21  ;;  %18 = sbr.rel (!%p16_p8) target bundleno = 4 (0x4), region = 83 }
 0x12d   :  { %454 = vsyncpa [#allocation3], 1 }
 0x12e   :  { %456 = vsyncpa [#allocation3 + $0x1], 1 }
 0x12f   :  { %457 = vsyncpa [#allocation5], 1 }

</bundles_post_ra>
